<compile_context>
chip_gen: v7x
topology: tpu7x:2x2x1
jax: 0.10.0
libtpu: 0.0.40
codegen_flags: <defaults>
</compile_context>

<pallas_src>
import functools

import jax
import jax.numpy as jnp
from jax.experimental import pallas as pl
from jax.experimental.pallas import tpu as pltpu

_LANES = 128
_SUBLANES = 8
_NUM_SPLITS = 2  # leading "parallel" grid axis (megacore split on v7x)


def _binary_f1_partials_kernel(d_ref, t_ref, sp1_ref, st1p1_ref, cnt1_ref,
                               *, tile_rows):
    """Accumulate partial sums over one (tile_rows, 128) lane-dense tile.

    d_ref   : (tile_rows, 128) f32   d = logits[:,1] - logits[:,0]
                                     (padded tail holds -inf -> p1 == 0)
    t_ref   : (tile_rows, 128) int32 labels in {0, 1} (padded tail holds 0)
    sp1_ref, st1p1_ref, cnt1_ref : (8, 128) f32 output accumulators
        sp1   = sum p1
        st1p1 = sum (t == 1) * p1   (== tp1)
        cnt1  = sum (t == 1)
    """
    j = pl.program_id(1)

    @pl.when(j == 0)
    def _init():
        sp1_ref[...] = jnp.zeros_like(sp1_ref)
        st1p1_ref[...] = jnp.zeros_like(st1p1_ref)
        cnt1_ref[...] = jnp.zeros_like(cnt1_ref)

    d = d_ref[...]
    # Binary softmax == sigmoid of the logit difference, sign-stabilized so
    # exp() only ever sees a non-positive argument (EUP op; VALU stays free).
    # d == -inf (padding) gives z == 0, p1 == 0 exactly: padding contributes
    # nothing to any accumulator, so no tail mask is needed.
    z = jnp.exp(-jnp.abs(d))
    inv = 1.0 / (1.0 + z)
    p1 = jnp.where(d >= 0.0, inv, z * inv)          # softmax(logits)[:, 1]
    t1 = (t_ref[...] == 1).astype(jnp.float32)

    # Fold tile_rows/8 vreg-rows into the fixed (8, 128) accumulators with
    # plain VALU adds (cross-lane XLU reduce is deferred to the wrapper).
    g = tile_rows // _SUBLANES
    p1_g = p1.reshape(g, _SUBLANES, _LANES)
    t1_g = t1.reshape(g, _SUBLANES, _LANES)

    sp1_ref[...] += jnp.sum(p1_g, axis=0)
    st1p1_ref[...] += jnp.sum(t1_g * p1_g, axis=0)
    cnt1_ref[...] += jnp.sum(t1_g, axis=0)


def binary_f1_loss(logits, target, epsilon=1e-7, tile_rows=1024):
    """Pallas TPU implementation of BinaryF1Loss.forward."""
    assert logits.ndim == 2
    assert target.ndim == 1
    n, c = logits.shape
    assert c == 2
    assert target.shape[0] == n

    # Single fused wrapper pass: only the f32 logit difference (4 B/elem) and
    # the int32 label ever reach the kernel, laid out lane-dense.
    d = logits[:, 1].astype(jnp.float32) - logits[:, 0].astype(jnp.float32)
    t = target.astype(jnp.int32)

    rows = pl.cdiv(n, _LANES)
    # Tile: multiple of 8 sublane-rows, ~1 MiB of input per grid step by
    # default, never larger than the (padded) data.
    tile_rows = max(_SUBLANES,
                    min((int(tile_rows) // _SUBLANES) * _SUBLANES,
                        pl.cdiv(rows, _SUBLANES) * _SUBLANES))
    tiles_per_split = pl.cdiv(rows, _NUM_SPLITS * tile_rows)
    padded_rows = _NUM_SPLITS * tiles_per_split * tile_rows
    padded_n = padded_rows * _LANES

    if padded_n != n:
        pad = padded_n - n
        # -inf makes p1 == 0 in-kernel; label 0 contributes nothing.
        d = jnp.pad(d, (0, pad), constant_values=-jnp.inf)
        t = jnp.pad(t, (0, pad))
    d2 = d.reshape(padded_rows, _LANES)
    t2 = t.reshape(padded_rows, _LANES)

    kernel = functools.partial(_binary_f1_partials_kernel, tile_rows=tile_rows)
    acc_shape = jax.ShapeDtypeStruct((_NUM_SPLITS, _SUBLANES, _LANES),
                                     jnp.float32)

    sp1_p, st1p1_p, cnt1_p = pl.pallas_call(
        kernel,
        out_shape=(acc_shape, acc_shape, acc_shape),
        grid_spec=pltpu.PrefetchScalarGridSpec(
            num_scalar_prefetch=0,
            grid=(_NUM_SPLITS, tiles_per_split),
            in_specs=[
                pl.BlockSpec((tile_rows, _LANES),
                             lambda i, j: (i * tiles_per_split + j, 0)),
                pl.BlockSpec((tile_rows, _LANES),
                             lambda i, j: (i * tiles_per_split + j, 0)),
            ],
            out_specs=[
                pl.BlockSpec((None, _SUBLANES, _LANES), lambda i, j: (i, 0, 0)),
                pl.BlockSpec((None, _SUBLANES, _LANES), lambda i, j: (i, 0, 0)),
                pl.BlockSpec((None, _SUBLANES, _LANES), lambda i, j: (i, 0, 0)),
            ],
        ),
        compiler_params=pltpu.CompilerParams(
            dimension_semantics=("parallel", "arbitrary")),
    )(d2, t2)

    # Tiny finalize over the (2, 8, 128) partials in plain JAX.
    eps = jnp.float32(epsilon)
    sp1 = jnp.sum(sp1_p)
    tp1 = jnp.sum(st1p1_p)
    cnt1 = jnp.sum(cnt1_p)
    n_f = jnp.float32(n)

    tp0 = n_f - cnt1 - sp1 + tp1
    e01 = cnt1 - tp1            # fp0 == fn1
    e10 = sp1 - tp1             # fp1 == fn0

    prec0 = tp0 / (tp0 + e01 + eps)
    rec0 = tp0 / (tp0 + e10 + eps)
    prec1 = tp1 / (tp1 + e10 + eps)
    rec1 = tp1 / (tp1 + e01 + eps)

    f1_0 = 2.0 * prec0 * rec0 / (prec0 + rec0 + eps)
    f1_1 = 2.0 * prec1 * rec1 / (prec1 + rec1 + eps)
    f1_0 = jnp.clip(f1_0, eps, 1.0 - eps)
    f1_1 = jnp.clip(f1_1, eps, 1.0 - eps)
    return 1.0 - 0.5 * (f1_0 + f1_1)


def _ref_loss(logits, target, eps=1e-7):
    """Plain-JAX reference of the PyTorch module's math."""
    pred = jax.nn.softmax(logits, axis=1)
    true = jax.nn.one_hot(target, 2, dtype=jnp.float32)
    tp = (true * pred).sum(axis=0)
    fp = ((1.0 - true) * pred).sum(axis=0)
    fn = (true * (1.0 - pred)).sum(axis=0)
    precision = tp / (tp + fp + eps)
    recall = tp / (tp + fn + eps)
    f1 = 2.0 * precision * recall / (precision + recall + eps)
    f1 = jnp.clip(f1, eps, 1.0 - eps)
    return 1.0 - f1.mean()


if __name__ == "__main__":
    key = jax.random.PRNGKey(0)
    k1, k2, k3, k4 = jax.random.split(key, 4)

    # Small case: ragged tail, grid (2, 1).
    N = 300
    logits = jax.random.normal(k1, (N, 2), dtype=jnp.float32)
    target = jax.random.randint(k2, (N,), 0, 2, dtype=jnp.int32)
    loss = binary_f1_loss(logits, target)
    jax.block_until_ready(loss)
    ref = _ref_loss(logits, target)
    assert jnp.allclose(loss, ref, atol=1e-5, rtol=1e-5), (loss, ref)

    # Slightly larger case with a tiny tile to exercise the multi-step
    # accumulation path: grid (2, 2).
    N2 = 3000
    logits2 = jax.random.normal(k3, (N2, 2), dtype=jnp.float32)
    target2 = jax.random.randint(k4, (N2,), 0, 2, dtype=jnp.int32)
    loss2 = binary_f1_loss(logits2, target2, tile_rows=8)
    jax.block_until_ready(loss2)
    ref2 = _ref_loss(logits2, target2)
    assert jnp.allclose(loss2, ref2, atol=1e-5, rtol=1e-5), (loss2, ref2)

    print("KERNEL_OK")
</pallas_src>

<mosaic_0001>
module attributes {stable_mosaic.version = 11 : i64} {
  func.func @_binary_f1_partials_kernel(%arg0: i32, %arg1: i32, %arg2: memref<8x128xf32, #tpu.memory_space<vmem>>, %arg3: memref<8x128xi32, #tpu.memory_space<vmem>>, %arg4: memref<1x8x128xf32, #tpu.memory_space<vmem>>, %arg5: memref<1x8x128xf32, #tpu.memory_space<vmem>>, %arg6: memref<1x8x128xf32, #tpu.memory_space<vmem>>) attributes {dimension_semantics = [#tpu.dimension_semantics<parallel>, #tpu.dimension_semantics<arbitrary>], iteration_bounds = array<i64: 2, 1>, scalar_prefetch = 0 : i64, scratch_operands = 0 : i64, tpu.core_type = #tpu.core_type<tc>, window_params = [{transform_indices = @transform_0, window_bounds = array<i64: 8, 128>}, {transform_indices = @transform_1, window_bounds = array<i64: 8, 128>}, {transform_indices = @transform_2, window_bounds = array<i64: 1, 8, 128>}, {transform_indices = @transform_3, window_bounds = array<i64: 1, 8, 128>}, {transform_indices = @transform_4, window_bounds = array<i64: 1, 8, 128>}]} {
    %c0_i32 = arith.constant 0 : i32
    %0 = arith.cmpi eq, %arg1, %c0_i32 : i32
    %1 = arith.extui %0 : i1 to i32
    %c0_i32_0 = arith.constant 0 : i32
    %2 = arith.cmpi ne, %1, %c0_i32_0 : i32
    scf.if %2 {
      %cst_28 = arith.constant 0.000000e+00 : f32
      %45 = vector.broadcast %cst_28 : f32 to vector<8x128xf32>
      %c0_29 = arith.constant 0 : index
      %c0_30 = arith.constant 0 : index
      %c0_31 = arith.constant 0 : index
      %46 = vector.load %arg4[%c0_29, %c0_30, %c0_31] : memref<1x8x128xf32, #tpu.memory_space<vmem>>, vector<1x8x128xf32>
      %47 = vector.shape_cast %46 : vector<1x8x128xf32> to vector<8x128xf32>
      %48 = vector.shape_cast %45 : vector<8x128xf32> to vector<1x8x128xf32>
      tpu.vector_store %arg4[%c0_29, %c0_30, %c0_31], %48 {strides = array<i32>} : memref<1x8x128xf32, #tpu.memory_space<vmem>>, vector<1x8x128xf32>,
      %cst_32 = arith.constant 0.000000e+00 : f32
      %49 = vector.broadcast %cst_32 : f32 to vector<8x128xf32>
      %c0_33 = arith.constant 0 : index
      %c0_34 = arith.constant 0 : index
      %c0_35 = arith.constant 0 : index
      %50 = vector.load %arg5[%c0_33, %c0_34, %c0_35] : memref<1x8x128xf32, #tpu.memory_space<vmem>>, vector<1x8x128xf32>
      %51 = vector.shape_cast %50 : vector<1x8x128xf32> to vector<8x128xf32>
      %52 = vector.shape_cast %49 : vector<8x128xf32> to vector<1x8x128xf32>
      tpu.vector_store %arg5[%c0_33, %c0_34, %c0_35], %52 {strides = array<i32>} : memref<1x8x128xf32, #tpu.memory_space<vmem>>, vector<1x8x128xf32>,
      %cst_36 = arith.constant 0.000000e+00 : f32
      %53 = vector.broadcast %cst_36 : f32 to vector<8x128xf32>
      %c0_37 = arith.constant 0 : index
      %c0_38 = arith.constant 0 : index
      %c0_39 = arith.constant 0 : index
      %54 = vector.load %arg6[%c0_37, %c0_38, %c0_39] : memref<1x8x128xf32, #tpu.memory_space<vmem>>, vector<1x8x128xf32>
      %55 = vector.shape_cast %54 : vector<1x8x128xf32> to vector<8x128xf32>
      %56 = vector.shape_cast %53 : vector<8x128xf32> to vector<1x8x128xf32>
      tpu.vector_store %arg6[%c0_37, %c0_38, %c0_39], %56 {strides = array<i32>} : memref<1x8x128xf32, #tpu.memory_space<vmem>>, vector<1x8x128xf32>,
    } else {
    }
    %c0 = arith.constant 0 : index
    %c0_1 = arith.constant 0 : index
    %3 = vector.load %arg2[%c0, %c0_1] : memref<8x128xf32, #tpu.memory_space<vmem>>, vector<8x128xf32>
    %4 = math.absf %3 : vector<8x128xf32>
    %cst = arith.constant 0.000000e+00 : f32
    %5 = vector.broadcast %cst : f32 to vector<8x128xf32>
    %6 = arith.subf %5, %4 : vector<8x128xf32>
    %7 = math.exp %6 : vector<8x128xf32>
    %cst_2 = arith.constant 1.000000e+00 : f32
    %8 = vector.broadcast %cst_2 : f32 to vector<8x128xf32>
    %9 = arith.addf %8, %7 : vector<8x128xf32>
    %cst_3 = arith.constant 1.000000e+00 : f32
    %10 = vector.broadcast %cst_3 : f32 to vector<8x128xf32>
    %11 = arith.divf %10, %9 : vector<8x128xf32>
    %cst_4 = arith.constant 0.000000e+00 : f32
    %12 = vector.broadcast %cst_4 : f32 to vector<8x128xf32>
    %13 = arith.cmpf oge, %3, %12 : vector<8x128xf32>
    %14 = arith.mulf %7, %11 : vector<8x128xf32>
    %15 = arith.select %13, %11, %14 : vector<8x128xi1>, vector<8x128xf32>
    %c0_5 = arith.constant 0 : index
    %c0_6 = arith.constant 0 : index
    %16 = vector.load %arg3[%c0_5, %c0_6] : memref<8x128xi32, #tpu.memory_space<vmem>>, vector<8x128xi32>
    %c1_i32 = arith.constant 1 : i32
    %17 = vector.broadcast %c1_i32 : i32 to vector<8x128xi32>
    %18 = arith.cmpi eq, %16, %17 : vector<8x128xi32>
    %19 = arith.extui %18 : vector<8x128xi1> to vector<8x128xi32>
    %20 = arith.sitofp %19 : vector<8x128xi32> to vector<8x128xf32>
    %21 = vector.shape_cast %15 : vector<8x128xf32> to vector<1x8x128xf32>
    %22 = vector.shape_cast %20 : vector<8x128xf32> to vector<1x8x128xf32>
    %c0_7 = arith.constant 0 : index
    %c0_8 = arith.constant 0 : index
    %c0_9 = arith.constant 0 : index
    %23 = vector.load %arg4[%c0_7, %c0_8, %c0_9] : memref<1x8x128xf32, #tpu.memory_space<vmem>>, vector<1x8x128xf32>
    %24 = vector.shape_cast %23 : vector<1x8x128xf32> to vector<8x128xf32>
    %cst_10 = arith.constant dense<0.000000e+00> : vector<8x128xf32>
    %25 = vector.multi_reduction <add>, %21, %cst_10 [0] : vector<1x8x128xf32> to vector<8x128xf32>
    %26 = arith.addf %24, %25 : vector<8x128xf32>
    %c0_11 = arith.constant 0 : index
    %c0_12 = arith.constant 0 : index
    %c0_13 = arith.constant 0 : index
    %27 = vector.load %arg4[%c0_11, %c0_12, %c0_13] : memref<1x8x128xf32, #tpu.memory_space<vmem>>, vector<1x8x128xf32>
    %28 = vector.shape_cast %27 : vector<1x8x128xf32> to vector<8x128xf32>
    %29 = vector.shape_cast %26 : vector<8x128xf32> to vector<1x8x128xf32>
    tpu.vector_store %arg4[%c0_11, %c0_12, %c0_13], %29 {strides = array<i32>} : memref<1x8x128xf32, #tpu.memory_space<vmem>>, vector<1x8x128xf32>,
    %c0_14 = arith.constant 0 : index
    %c0_15 = arith.constant 0 : index
    %c0_16 = arith.constant 0 : index
    %30 = vector.load %arg5[%c0_14, %c0_15, %c0_16] : memref<1x8x128xf32, #tpu.memory_space<vmem>>, vector<1x8x128xf32>
    %31 = vector.shape_cast %30 : vector<1x8x128xf32> to vector<8x128xf32>
    %32 = arith.mulf %22, %21 : vector<1x8x128xf32>
    %cst_17 = arith.constant dense<0.000000e+00> : vector<8x128xf32>
    %33 = vector.multi_reduction <add>, %32, %cst_17 [0] : vector<1x8x128xf32> to vector<8x128xf32>
    %34 = arith.addf %31, %33 : vector<8x128xf32>
    %c0_18 = arith.constant 0 : index
    %c0_19 = arith.constant 0 : index
    %c0_20 = arith.constant 0 : index
    %35 = vector.load %arg5[%c0_18, %c0_19, %c0_20] : memref<1x8x128xf32, #tpu.memory_space<vmem>>, vector<1x8x128xf32>
    %36 = vector.shape_cast %35 : vector<1x8x128xf32> to vector<8x128xf32>
    %37 = vector.shape_cast %34 : vector<8x128xf32> to vector<1x8x128xf32>
    tpu.vector_store %arg5[%c0_18, %c0_19, %c0_20], %37 {strides = array<i32>} : memref<1x8x128xf32, #tpu.memory_space<vmem>>, vector<1x8x128xf32>,
    %c0_21 = arith.constant 0 : index
    %c0_22 = arith.constant 0 : index
    %c0_23 = arith.constant 0 : index
    %38 = vector.load %arg6[%c0_21, %c0_22, %c0_23] : memref<1x8x128xf32, #tpu.memory_space<vmem>>, vector<1x8x128xf32>
    %39 = vector.shape_cast %38 : vector<1x8x128xf32> to vector<8x128xf32>
    %cst_24 = arith.constant dense<0.000000e+00> : vector<8x128xf32>
    %40 = vector.multi_reduction <add>, %22, %cst_24 [0] : vector<1x8x128xf32> to vector<8x128xf32>
    %41 = arith.addf %39, %40 : vector<8x128xf32>
    %c0_25 = arith.constant 0 : index
    %c0_26 = arith.constant 0 : index
    %c0_27 = arith.constant 0 : index
    %42 = vector.load %arg6[%c0_25, %c0_26, %c0_27] : memref<1x8x128xf32, #tpu.memory_space<vmem>>, vector<1x8x128xf32>
    %43 = vector.shape_cast %42 : vector<1x8x128xf32> to vector<8x128xf32>
    %44 = vector.shape_cast %41 : vector<8x128xf32> to vector<1x8x128xf32>
    tpu.vector_store %arg6[%c0_25, %c0_26, %c0_27], %44 {strides = array<i32>} : memref<1x8x128xf32, #tpu.memory_space<vmem>>, vector<1x8x128xf32>,
    return
  }
  func.func @transform_0(%arg0: i32, %arg1: i32) -> (i32, i32) {
    %c1_i32 = arith.constant 1 : i32
    %0 = arith.muli %arg0, %c1_i32 : i32
    %1 = arith.addi %0, %arg1 : i32
    %c0_i32 = arith.constant 0 : i32
    %c0_i32_0 = arith.constant 0 : i32
    return %1, %c0_i32 : i32, i32
  }
  func.func @transform_1(%arg0: i32, %arg1: i32) -> (i32, i32) {
    %c1_i32 = arith.constant 1 : i32
    %0 = arith.muli %arg0, %c1_i32 : i32
    %1 = arith.addi %0, %arg1 : i32
    %c0_i32 = arith.constant 0 : i32
    %c0_i32_0 = arith.constant 0 : i32
    return %1, %c0_i32 : i32, i32
  }
  func.func @transform_2(%arg0: i32, %arg1: i32) -> (i32, i32, i32) {
    %c0_i32 = arith.constant 0 : i32
    %c0_i32_0 = arith.constant 0 : i32
    %c0_i32_1 = arith.constant 0 : i32
    return %arg0, %c0_i32, %c0_i32_0 : i32, i32, i32
  }
  func.func @transform_3(%arg0: i32, %arg1: i32) -> (i32, i32, i32) {
    %c0_i32 = arith.constant 0 : i32
    %c0_i32_0 = arith.constant 0 : i32
    %c0_i32_1 = arith.constant 0 : i32
    return %arg0, %c0_i32, %c0_i32_0 : i32, i32, i32
  }
  func.func @transform_4(%arg0: i32, %arg1: i32) -> (i32, i32, i32) {
    %c0_i32 = arith.constant 0 : i32
    %c0_i32_0 = arith.constant 0 : i32
    %c0_i32_1 = arith.constant 0 : i32
    return %arg0, %c0_i32, %c0_i32_0 : i32, i32, i32
  }
}

</mosaic_0001>

<bundles_post_ra>
// kernel: tpu_custom_call.1
= control target key start
LH: loop header
LB: loop body
LE: loop exit
PB: predicated region body
PF: predicated region fallthrough
CT: control target
= control target key end

     0   :  { %s1183_s0 = inlined_call_operand.hbm [shape: f32[16,128], index: 0, kind: input, shape index: {}]   ;;  %s1184_s1 = inlined_call_operand.hbm [shape: s32[16,128], index: 1, kind: input, shape index: {}]   ;;  %s1185_s2 = inlined_call_operand.hbm [shape: f32[2,8,128], index: 2, kind: output, shape index: {0}]   ;;  %s1186_s3 = inlined_call_operand.hbm [shape: f32[2,8,128], index: 3, kind: output, shape index: {1}]   ;;  %s1187_s4 = inlined_call_operand.hbm [shape: f32[2,8,128], index: 4, kind: output, shape index: {2}]  }
   0x1   :  { %1192 = sst [smem:[#allocation15_spill]] %s1183_s0 }
   0x2   :  { %1193 = sst [smem:[#allocation16_spill]] %s1184_s1 }
   0x3   :  { %10 = vsyncpa [#allocation3], 0 }
   0x4   :  { %12 = vsyncpa [#allocation3 + $0x1], 0 }
   0x5   :  { %13 = vsyncpa [#allocation6], 0 }
   0x6   :  { %15 = vsyncpa [#allocation6 + $0x1], 0 }
   0x7   :  { %16 = vsyncpa [#allocation4], 0 }
   0x8   :  { %18 = vsyncpa [#allocation4 + $0x1], 0 }
   0x9   :  { %19 = vsyncpa [#allocation9], 0 }
   0xa   :  { %21 = vsyncpa [#allocation9 + $0x1], 0  ;;  %s881_s15 = smov 0   ;;  %s883_s16 = smov 0  }
   0xb   :  { %s885_s17 = smov 0   ;;  %s887_s18 = smov 0  }
   0xc   :  { %s889_s19 = smov 0   ;;  %s891_s20 = smov 0  }
   0xd LB: > { %s912_s21 = sadd.s32 4294967295, %s848_s20   ;;  %s1188_s22 = sadd.s32 4294967294, %s848_s20   ;;  %s848_s20 = sphi %s891_s20, %s27_s20   ;;  %s844_s19 = sphi %s889_s19, %s1216_s19   ;;  %s840_s18 = sphi %s887_s18, %s1215_s18   ;;  %s836_s17 = sphi %s885_s17, %s1214_s17   ;;  %s832_s16 = sphi %s883_s16, %s1213_s16   ;;  %s828_s15 = sphi %s881_s15, %s1212_s15  }
   0xe   : > { %s39_s23 = sadd.s32 1, %s844_s19  ;;  %s48_s24 = sadd.s32 1, %s836_s17 }
   0xf   : > { %p41_p0 = scmp.ge.s32.totalorder %s39_s23, 2  ;;  %p55_p1 = scmp.ne.s32.totalorder %s836_s17, %s832_s16 }
  0x10   : > { %p56_p2 = scmp.eq.s32.totalorder %s848_s20, 0  ;;  %p61_p3 = scmp.ne.s32.totalorder %s832_s16, %s828_s15 }
  0x11   : > { %s1218_s23 = smov (%p41_p0, %s39_s23), 0  ;;  %p62_p5 = scmp.eq.s32.totalorder %s912_s21, 0 }
  0x12   : > { %p924_p4 = por %p56_p2, %p55_p1  ;;  %s45_s26 = ssub.s32 %s844_s19, %s1218_s23 }
  0x13   : > { %p113_p6 = scmp.eq.s32.totalorder %s912_s21, 1  ;;  %p46_p7 = scmp.eq.s32.totalorder %s45_s26, 0 }
  0x14   : > { %p932_p8 = por %p62_p5, %p61_p3  ;;  %p119_p10 = scmp.eq.s32.totalorder %s1188_s22, 1 }
  0x15   : > { %p936_p9 = por %p113_p6, %p55_p1  ;;  %p587_p13 = scmp.lt.s32.totalorder %s848_s20, 2 }
  0x16   : > { %s1195_s27 = scalar_select %p932_p8, 1, 0 }
  0x17   : > { %s1196_s28 = scalar_select %p936_p9, 1, 0 }
  0x18   : > { %s943_s29 = scalar_select %p46_p7, %s836_s17, %s48_s24  }
  0x19   : > { %p945_p11 = por %p119_p10, %p61_p3  ;;  %s952_s5 = sand.u32 1, %s836_s17  }
  0x1a   : > { %s541_s6 = sshll.u32 %s952_s5, 3  ;;  %s542_s7 = sshll.u32 %s844_s19, 7 }
  0x1b   : > { %s1197_s30 = scalar_select %p945_p11, 1, 0 }
  0x1c   : > { %s1198_s0 = sld [smem:[#allocation15_spill]]  ;;  %s195_s11 = scalar_lea.vmem [#allocation2], %s541_s6 }
  0x1d   : > { %s203_s12 = sshll.u32 %s195_s11, 4  ;;  %p969_p0 = pnand %p587_p13, %p924_p4  ;;  %s965_s12 = int_to_ptr.vmem [resolvable:$true] %s203_s12 }
  0x1e   : > { %s192_s14 = scalar_lea.sflag [#allocation3], %s952_s5 }
  0x1f   : > { %p644_p5 = pneg %p969_p0 }
  0x22   : > { %s961_s10 = scalar_lea.hbm %s1198_s0, %s542_s7  ;;  %s647_s25 = scalar_lea.hbm %s1198_s0, 256 }
  0x23   : > { %s642_s24 = scalar_lea.hbm %s961_s10, 128  ;;  %p648_p4 = scmp.lt.u32.totalorder %s961_s10, %s1198_s0 }
  0x24   : > { %p643_p3 = scmp.ne.s32.totalorder %s961_s10, %s642_s24  ;;  %p649_p10 = scmp.lt.u32.totalorder %s647_s25, %s642_s24 }
  0x25   : > { %p651_p12 = scmp.lt.u32.totalorder %s642_s24, %s961_s10 }
  0x26   : > { %p645_p6 = pnand %p644_p5, %p643_p3  ;;  %p650_p13 = por %p649_p10, %p648_p4 }
  0x28   : > { %p646_p7 = pneg %p645_p6  ;;  %p652_p1 = por %p651_p12, %p650_p13 }
  0x2a   : > { %p653_p2 = pnand %p652_p1, %p646_p7 }
  0x2c   : > { %656 = shalt.err (!%p653_p2)
}
  0x2d   : > { %s657_s22 = scalar_lea.vmem %s965_s12, 128  ;;  %s850_s26 = smov [#allocation2]  }
  0x2e   : > { %p658_p3 = scmp.ne.s32.totalorder %s965_s12, %s657_s22  ;;  %s662_s8 = sshll.u32 %s850_s26, 4  ;;  %s663_s8 = int_to_ptr.vmem [resolvable:$false] %s662_s8 }
  0x2f   : > { %s664_s9 = scalar_lea.vmem %s663_s8, 256  ;;  %p665_p9 = scmp.lt.s32.totalorder %s965_s12, %s663_s8 }
  0x30   : > { %p660_p6 = pnand %p658_p3, %p644_p5  ;;  %p666_p4 = scmp.lt.s32.totalorder %s664_s9, %s657_s22 }
  0x32   : > { %p661_p11 = pneg %p660_p6  ;;  %p667_p10 = por %p666_p4, %p665_p9 }
  0x34   : > { %p668_p12 = pnand %p667_p10, %p661_p11 }
  0x36   : > { %671 = shalt.err (!%p668_p12)
}
  0x37   : > { %573 = dma.hbm_to_vmem [thread:$0]  (!%p969_p0), %s961_s10, 128, %s965_s12, %s192_s14  }
  0x38   : > { %p1200_p1 = scmp.lt.s32.totalorder %s848_s20, 3  ;;  %p1201_p2 = scmp.ge.s32.totalorder %s848_s20, 1 }
  0x39   : > { %s1203_s1 = sld [smem:[#allocation16_spill]]  ;;  %s214_s26 = scalar_lea.vmem [#allocation5], %s541_s6 }
  0x3a   : > { %p1005_p7 = pnand %p1201_p2, %p1200_p1  ;;  %s222_s8 = sshll.u32 %s214_s26, 4  ;;  %s223_s8 = int_to_ptr.vmem [resolvable:$true] %s222_s8 }
  0x3b   : > { %s211_s10 = scalar_lea.sflag [#allocation6], %s952_s5 }
  0x3c   : > { %s1202_s24 = scalar_select %p1005_p7, 1, 0 }
  0x3f   : > { %s1014_s11 = scalar_lea.hbm %s1203_s1, %s542_s7  ;;  %s677_s7 = scalar_lea.hbm %s1203_s1, 256 }
  0x40   : > { %s672_s12 = scalar_lea.hbm %s1014_s11, 128  ;;  %p678_p3 = scmp.lt.u32.totalorder %s1014_s11, %s1203_s1 }
  0x41   : > { %p673_p9 = scmp.ne.s32.totalorder %s1014_s11, %s672_s12  ;;  %p679_p6 = scmp.lt.u32.totalorder %s677_s7, %s672_s12 }
  0x42   : > { %p681_p10 = scmp.lt.u32.totalorder %s672_s12, %s1014_s11 }
  0x43   : > { %p675_p11 = pnand %p673_p9, %p644_p5  ;;  %p680_p4 = por %p679_p6, %p678_p3 }
  0x45   : > { %p676_p13 = pneg %p675_p11  ;;  %p682_p12 = por %p681_p10, %p680_p4 }
  0x47   : > { %p683_p1 = pnand %p682_p12, %p676_p13 }
  0x49   : > { %686 = shalt.err (!%p683_p1)
}
  0x4a   : > { %s687_s5 = scalar_lea.vmem %s223_s8, 128  ;;  %s851_s6 = smov [#allocation5]  }
  0x4b   : > { %p688_p2 = scmp.ne.s32.totalorder %s223_s8, %s687_s5  ;;  %s692_s26 = sshll.u32 %s851_s6, 4  ;;  %s693_s26 = int_to_ptr.vmem [resolvable:$false] %s692_s26 }
  0x4c   : > { %s694_s14 = scalar_lea.vmem %s693_s26, 256  ;;  %p695_p8 = scmp.lt.s32.totalorder %s223_s8, %s693_s26 }
  0x4d   : > { %p690_p9 = pnand %p688_p2, %p644_p5  ;;  %p696_p7 = scmp.lt.s32.totalorder %s694_s14, %s687_s5 }
  0x4f   : > { %p691_p11 = pneg %p690_p9  ;;  %p697_p3 = por %p696_p7, %p695_p8 }
  0x51   : > { %p698_p6 = pnand %p697_p3, %p691_p11 }
  0x53   : > { %701 = shalt.err (!%p698_p6)
}
  0x54   : > { %576 = dma.hbm_to_vmem [thread:$0]  (!%p969_p0), %s1014_s11, 128, %s223_s8, %s211_s10  }
  0x55   : > { %p1204_p13 = scmp.ne.s32.totalorder %s1202_s24, 0 }
  0x56   : > { %s1041_s12 = sand.u32 (!%p1204_p13), 1, %s832_s16   ;;  %p1205_p8 = scmp.ne.s32.totalorder (!%p1204_p13), %s1195_s27, 0 }
  0x57   : > { %231 = sbr.rel (%p1204_p13) target bundleno = 191 (0xbf), region = 28  ;;  %s1044_s9 = sshll.u32 (!%p1204_p13), %s1041_s12, 3 }
  0x58   : > { %s234_s7 = scalar_lea.sflag (!%p1204_p13), [#allocation3], %s1041_s12  ;;  %s237_s22 = scalar_lea.vmem (!%p1204_p13), [#allocation2], %s1044_s9 }
  0x5e   : > { %811 = dma.done.wait (%p1205_p8), %s234_s7, 128  }
  0x5f   : > { %813 = vsyncadd (%p1205_p8), %s234_s7, 4294967168  ;;  %s243_s13 = scalar_lea.sflag [#allocation6], %s1041_s12  ;;  %s246_s24 = scalar_lea.vmem [#allocation5], %s1044_s9 }
  0x60   : > { %815 = dma.done.wait (%p1205_p8), %s243_s13, 128  }
  0x61   : > { %817 = vsyncadd (%p1205_p8), %s243_s13, 4294967168  ;;  %v295_v0 = vld [vmem:[%s237_s22] sm:$0xff]  ;;  %v306_v1 = vld [vmem:[%s246_s24] sm:$0xff]  ;;  %v852_v3 = vmov 0.0   ;;  %s285_s11 = scalar_lea.vmem [#allocation10], %s1044_s9  ;;  %s555_s8 = sshll.u32 %s840_s18, 7 }
  0x62   : > { %v296_v2 = vand.u32 2147483647, %v295_v0  ;;  %vm307_vm0 = vcmp.eq.s32.totalorder %v306_v1, 1  ;;  %vm303_vm1 = vcmp.ge.f32.partialorder %v295_v0, 0.0  ;;  %s271_s10 = scalar_lea.vmem [#allocation7], %s1044_s9  ;;  %s373_s5 = sshll.u32 %s285_s11, 4  ;;  %s1072_s5 = int_to_ptr.vmem [resolvable:$true] %s373_s5 }
  0x63   : > { %v551_v4 = vsel %vm307_vm0, 1.0, %v852_v3  ;;  %s347_s25 = sshll.u32 %s271_s10, 4  ;;  %s1191_s6 = scalar_lea.vmem [#allocation8], %s1044_s9  ;;  %s1070_s25 = int_to_ptr.vmem [resolvable:$true] %s347_s25 }
  0x64   : > { %v297_v5 = vsub.f32 0.0, %v296_v2  ;;  %322 = vst [vmem:[%s285_s11] sm:$0xff] %v551_v4  ;;  %s360_s26 = sshll.u32 %s1191_s6, 4  ;;  %s1068_s22 = scalar_lea.hbm %s1185_s2, %s555_s8  ;;  %s1079_s26 = int_to_ptr.vmem [resolvable:$true] %s360_s26 }
  0x65   : > { %s1077_s24 = scalar_lea.hbm %s1186_s3, %s555_s8  ;;  %s1084_s14 = scalar_lea.hbm %s1187_s4, %s555_s8 }
  0x66   : > { %v298_v6 = vmul.f32 1.442695, %v297_v5  ;;  %s324_s7 = scalar_lea.sflag [#allocation4], %s1041_s12  ;;  %s702_s6 = scalar_lea.vmem %s1070_s25, 128 }
  0x67   : > { %p703_p0 = scmp.ne.s32.totalorder %s1070_s25, %s702_s6  ;;  %p1206_p5 = scmp.ne.s32.totalorder %s1196_s28, 0 }
  0x68   : > { %638 = vpow2.f32 %v298_v6  ;;  %s853_s0 = smov [#allocation7]  }
  0x69   : > { %p704_p7 = pnand %p703_p0, %p1206_p5  ;;  %s706_s1 = sshll.u32 %s853_s0, 4  ;;  %s707_s1 = int_to_ptr.vmem [resolvable:$false] %s706_s1 }
  0x6a   : > { %s708_s18 = scalar_lea.vmem %s707_s1, 256  ;;  %p709_p10 = scmp.lt.s32.totalorder %s1070_s25, %s707_s1 }
  0x6b   : > { %p705_p4 = pneg %p704_p7  ;;  %p710_p12 = scmp.lt.s32.totalorder %s708_s18, %s702_s6 }
  0x6d   : > { %p711_p1 = por %p710_p12, %p709_p10 }
  0x6f   : > { %p712_p2 = pnand %p711_p1, %p705_p4 }
  0x72   : > { %v639_v7 = vpop.eup %638 }
  0x73   : > { %v300_v8 = vadd.f32 1.0, %v639_v7 }
  0x75   : > { %640 = vrcp.f32 %v300_v8 }
  0x7f   : > { %v641_v9 = vpop.eup %640 }
  0x80   : > { %v304_v10 = vmul.f32 %v641_v9, %v639_v7 }
  0x82   : > { %v305_v11 = vsel %vm303_vm1, %v641_v9, %v304_v10 }
  0x83   : > { %v315_v12 = vmul.f32 %v551_v4, %v305_v11  ;;  %313 = vst [vmem:[%s271_s10] sm:$0xff] %v305_v11 }
  0x84   : > { %715 = shalt.err (!%p712_p2)
}
  0x85   : > { %s716_s12 = scalar_lea.hbm %s1068_s22, 128  ;;  %s720_s0 = scalar_lea.hbm %s1185_s2, 256 }
  0x86   : > { %p717_p9 = scmp.ne.s32.totalorder %s1068_s22, %s716_s12  ;;  %p721_p6 = scmp.lt.u32.totalorder %s1068_s22, %s1185_s2 }
  0x87   : > { %p722_p13 = scmp.lt.u32.totalorder %s720_s0, %s716_s12  ;;  %p724_p0 = scmp.lt.u32.totalorder %s716_s12, %s1068_s22 }
  0x88   : > { %p718_p11 = pnand %p717_p9, %p1206_p5 }
  0x89   : > { %p723_p8 = por %p722_p13, %p721_p6 }
  0x8a   : > { %p719_p3 = pneg %p718_p11 }
  0x8b   : > { %p725_p7 = por %p724_p0, %p723_p8 }
  0x8d   : > { %p726_p4 = pnand %p725_p7, %p719_p3 }
  0x8f   : > { %729 = shalt.err (!%p726_p4)
}
  0x90   : > { %564 = dma.vmem_to_hbm [thread:$0]  (%p1206_p5), %s1070_s25, 128, %s1068_s22, %s324_s7  }
  0x91   : > { %s1207_s6 = scalar_lea.vmem [#allocation8], %s1044_s9  ;;  %s1208_s13 = sand.u32 1, %s912_s21  }
  0x92   : > { %318 = vst [vmem:[%s1207_s6] sm:$0xff] %v315_v12  ;;  %s1112_s11 = scalar_lea.sflag [#allocation9], %s1208_s13  ;;  %s730_s18 = scalar_lea.vmem %s1079_s26, 128 }
  0x93   : > { %p731_p10 = scmp.ne.s32.totalorder %s1079_s26, %s730_s18  ;;  %s854_s12 = smov [#allocation8]  }
  0x94   : > { %s734_s27 = sshll.u32 %s854_s12, 4  ;;  %s735_s27 = int_to_ptr.vmem [resolvable:$false] %s734_s27 }
  0x95   : > { %p732_p12 = pnand %p731_p10, %p1206_p5  ;;  %s736_s8 = scalar_lea.vmem %s735_s27, 256 }
  0x96   : > { %p737_p2 = scmp.lt.s32.totalorder %s1079_s26, %s735_s27  ;;  %p738_p9 = scmp.lt.s32.totalorder %s736_s8, %s730_s18 }
  0x97   : > { %p733_p1 = pneg %p732_p12 }
  0x98   : > { %p739_p11 = por %p738_p9, %p737_p2 }
  0x9a   : > { %p740_p3 = pnand %p739_p11, %p733_p1 }
  0x9c   : > { %743 = shalt.err (!%p740_p3)
}
  0x9d   : > { %s744_s21 = scalar_lea.hbm %s1077_s24, 128  ;;  %s748_s22 = scalar_lea.hbm %s1186_s3, 256 }
  0x9e   : > { %p745_p6 = scmp.ne.s32.totalorder %s1077_s24, %s744_s21  ;;  %p749_p0 = scmp.lt.u32.totalorder %s1077_s24, %s1186_s3 }
  0x9f   : > { %p750_p7 = scmp.lt.u32.totalorder %s748_s22, %s744_s21  ;;  %p752_p10 = scmp.lt.u32.totalorder %s744_s21, %s1077_s24 }
  0xa0   : > { %p746_p13 = pnand %p745_p6, %p1206_p5 }
  0xa1   : > { %p751_p4 = por %p750_p7, %p749_p0 }
  0xa2   : > { %p747_p8 = pneg %p746_p13 }
  0xa3   : > { %p753_p12 = por %p752_p10, %p751_p4 }
  0xa5   : > { %p754_p1 = pnand %p753_p12, %p747_p8 }
  0xa7   : > { %757 = shalt.err (!%p754_p1)
}
  0xa8   : > { %565 = dma.vmem_to_hbm [thread:$0]  (%p1206_p5), %s1079_s26, 128, %s1077_s24, %s1112_s11  }
  0xa9   : > { %s758_s10 = scalar_lea.vmem %s1072_s5, 128  ;;  %s855_s1 = smov [#allocation10]  }
  0xaa   : > { %p759_p2 = scmp.ne.s32.totalorder %s1072_s5, %s758_s10  ;;  %s762_s6 = sshll.u32 %s855_s1, 4  ;;  %s763_s6 = int_to_ptr.vmem [resolvable:$false] %s762_s6 }
  0xab   : > { %s764_s13 = scalar_lea.vmem %s763_s6, 256  ;;  %p765_p3 = scmp.lt.s32.totalorder %s1072_s5, %s763_s6 }
  0xac   : > { %p760_p9 = pnand %p759_p2, %p1206_p5  ;;  %p766_p6 = scmp.lt.s32.totalorder %s764_s13, %s758_s10 }
  0xae   : > { %p761_p11 = pneg %p760_p9  ;;  %p767_p13 = por %p766_p6, %p765_p3 }
  0xb0   : > { %p768_p8 = pnand %p767_p13, %p761_p11 }
  0xb2   : > { %771 = shalt.err (!%p768_p8)
}
  0xb3   : > { %s772_s26 = scalar_lea.hbm %s1084_s14, 128  ;;  %s776_s12 = scalar_lea.hbm %s1187_s4, 256 }
  0xb4   : > { %p773_p0 = scmp.ne.s32.totalorder %s1084_s14, %s772_s26  ;;  %p777_p10 = scmp.lt.u32.totalorder %s1084_s14, %s1187_s4 }
  0xb5   : > { %p778_p12 = scmp.lt.u32.totalorder %s776_s12, %s772_s26  ;;  %p780_p2 = scmp.lt.u32.totalorder %s772_s26, %s1084_s14 }
  0xb6   : > { %p774_p7 = pnand %p773_p0, %p1206_p5 }
  0xb7   : > { %p779_p1 = por %p778_p12, %p777_p10 }
  0xb8   : > { %p775_p4 = pneg %p774_p7 }
  0xb9   : > { %p781_p9 = por %p780_p2, %p779_p1 }
  0xbb   : > { %p782_p11 = pnand %p781_p9, %p775_p4 }
  0xbd   : > { %785 = shalt.err (!%p782_p11)
}
  0xbe   : > { %566 = dma.vmem_to_hbm [thread:$0]  (%p1206_p5), %s1072_s5, 128, %s1084_s14, %s1112_s11  }
  0xbf PF: > { %s385_s21 = sand.u32 1, %s828_s15   ;;  %p1209_p3 = scmp.ne.s32.totalorder %s1197_s30, 0 }
  0xc0   : > { %p1210_p6 = scmp.ge.s32.totalorder %s848_s20, 2  ;;  %s386_s9 = scalar_lea.sflag [#allocation4], %s385_s21 }
  0xc2   : > { %p578_p13 = pnand %p1210_p6, %p1209_p3 }
  0xc4   : > { %819 = dma.done.wait (!%p578_p13), %s386_s9, 128  }
  0xc5   : > { %821 = vsyncadd (!%p578_p13), %s386_s9, 4294967168  ;;  %s1211_s25 = sadd.s32 4294967294, %s848_s20  }
  0xc6   : > { %s394_s22 = sand.u32 1, %s1211_s25  }
  0xc7   : > { %s395_s7 = scalar_lea.sflag [#allocation9], %s394_s22 }
  0xc8   : > { %823 = dma.done.wait (!%p578_p13), %s395_s7, 256  }
  0xc9   : > { %825 = vsyncadd (!%p578_p13), %s395_s7, 4294967040  ;;  %s27_s20 = sadd.s32 1, %s848_s20   ;;  %s1212_s15 = smov %s832_s16 }
  0xca   : > { %p24_p5 = scmp.ge.s32.totalorder %s27_s20, 4   ;;  %s1213_s16 = smov %s836_s17 }
  0xcb   : > { %s1214_s17 = smov %s943_s29  ;;  %s1215_s18 = smov %s844_s19 }
  0xcc   : > { %s1216_s19 = smov %s1218_s23  ;;  %26 = sbr.rel (!%p24_p5) target bundleno = 13 (0xd), region = 122 }
  0xd3   :  { %409 = vsyncpa [#allocation3], 1 }
  0xd4   :  { %411 = vsyncpa [#allocation3 + $0x1], 1 }
  0xd5   :  { %412 = vsyncpa [#allocation6], 1 }
  0xd6   :  { %414 = vsyncpa [#allocation6 + $0x1], 1 }
  0xd7   :  { %415 = vsyncpa [#allocation4], 1 }
  0xd8   :  { %417 = vsyncpa [#allocation4 + $0x1], 1 }
  0xd9   :  { %418 = vsyncpa [#allocation9], 1 }
  0xda   :  { %420 = vsyncpa [#allocation9 + $0x1], 1 }

</bundles_post_ra>
